<compile_context>
chip_gen: v7x
topology: tpu7x:2x2x1
jax: 0.10.0
libtpu: 0.0.40
codegen_flags: <defaults>
</compile_context>

<pallas_src>
import jax
import jax.numpy as jnp
from jax.experimental import pallas as pl
from jax.experimental.pallas import tpu as pltpu

# ----------------------------- synthetic config ------------------------------
CONFIG = dict(
    GAT_layers=2, GAT_indim=6, GAT_hiddim=8, GAT_outdim=9, GAT_heads=2,
    GAT_feat_drop=0.0, GAT_attn_drop=0.0, GAT_negative_slope=0.2,
    GAT_residual=True,
    disProj_hiddim=16, disProj_layers=2,
)
N_NODES = 16                     # N*N = 256 OD-pair (edge) columns on the lane axis


# ----------------------------- parameter helpers -----------------------------
def _linear(key, in_dim, out_dim, scale=0.1):
    kw, kb = jax.random.split(key)
    w = jax.random.normal(kw, (in_dim, out_dim), jnp.float32) * scale
    b = jax.random.normal(kb, (1, out_dim), jnp.float32) * scale
    return w, b


def _gat_layer_params(key, in_dim, out_dim, heads, residual):
    k1, k2, k3, k4, k5 = jax.random.split(key, 5)
    p = dict(
        W=jax.random.normal(k1, (in_dim, heads * out_dim), jnp.float32) * 0.1,
        attn_l=jax.random.normal(k2, (heads, out_dim), jnp.float32) * 0.1,
        attn_r=jax.random.normal(k3, (heads, out_dim), jnp.float32) * 0.1,
        bias=jax.random.normal(k4, (heads * out_dim,), jnp.float32) * 0.1,
        res_W=None,
    )
    if residual and in_dim != heads * out_dim:
        p['res_W'] = jax.random.normal(k5, (in_dim, heads * out_dim),
                                       jnp.float32) * 0.1
    return p


# ------------------------- plain-JAX graph-side glue --------------------------
# TODO(synk): DGL's sparse edge-softmax GATConv has no clean Pallas equivalent;
# implemented as dense masked attention over the (N, N) adjacency in jitted JAX
# (N=16 nodes -> negligible next to the N*N edge path, and fused by XLA).
def gat_conv(adj, h, p, heads, out_feats, neg_slope, activation):
    n = h.shape[0]
    feat = (h @ p['W']).reshape(n, heads, out_feats)                # (N, H, F)
    el = (feat * p['attn_l'][None]).sum(-1)                         # (N, H)
    er = (feat * p['attn_r'][None]).sum(-1)                         # (N, H)
    e = el[None, :, :] + er[:, None, :]                             # (dst, src, H)
    e = jnp.where(e >= 0, e, neg_slope * e)
    e = jnp.where(adj[:, :, None] > 0, e, -jnp.inf)
    alpha = jax.nn.softmax(e, axis=1)                               # over src
    rst = jnp.einsum('dsh,shf->dhf', alpha, feat)                   # (N, H, F)
    if p['res_W'] is not None:
        rst = rst + (h @ p['res_W']).reshape(n, heads, out_feats)
    rst = rst + p['bias'].reshape(1, heads, out_feats)
    if activation is not None:
        rst = activation(rst)
    return rst


def gat_forward(attr, adj, params, cfg):
    h = gat_conv(adj, attr, params[0], cfg['GAT_heads'], cfg['GAT_hiddim'],
                 cfg['GAT_negative_slope'], jax.nn.elu)
    h = h.reshape(h.shape[0], -1)                                   # flatten(1)
    h = gat_conv(adj, h, params[1], cfg['GAT_heads'], cfg['GAT_outdim'],
                 cfg['GAT_negative_slope'], None)
    return h.mean(axis=1)                                           # mean over heads


# --------------------------- weight packing (edge path) -----------------------
def _round_up8(x):
    return ((x + 7) // 8) * 8


def _pad_block(a, rows, cols):
    a = jnp.asarray(a, jnp.float32)
    return jnp.pad(a, ((0, rows - a.shape[0]), (0, cols - a.shape[1])))


def pack_edge_weights(dp_params, fc_params):
    """Pack disProj + Predictor.fc weights into ONE slab.

    Every block starts at a sublane-(8)-aligned row and at lane 0, so the
    kernel's static slices are relayout-free.  Returns (slab, meta); meta holds
    the static row offsets / dims the kernel closes over.
    """
    dph = dp_params['Win'].shape[1]
    n_layers = len(dp_params['layers'])
    fc_w, fc_b = fc_params
    e_out = fc_w.shape[1]

    blocks, w_offs, row = [], [], 0
    for (w, _) in dp_params['layers']:                 # transposed (dph, dph) weights
        w_offs.append(row)
        blocks.append(w.T)
        row += _round_up8(dph)
    v_off = row                                        # [Win^T | bin^T | b_1^T .. b_L^T]
    dp_vec = jnp.concatenate([dp_params['Win'].T, dp_params['bin'].T]
                             + [b.T for (_, b) in dp_params['layers']], axis=1)
    blocks.append(dp_vec)
    row += _round_up8(dph)
    fc_off = row                                       # [W^T | b^T]  (e_out, 2E+dph+1)
    fc_packed = jnp.concatenate([fc_w.T, fc_b.T], axis=1)
    blocks.append(fc_packed)
    row += _round_up8(e_out)

    cols = max(b.shape[1] for b in blocks)
    slab = jnp.concatenate(
        [_pad_block(b, _round_up8(b.shape[0]), cols) for b in blocks], axis=0)
    meta = dict(dph=dph, n_layers=n_layers, e_out=e_out,
                w_offs=tuple(w_offs), v_off=v_off, fc_off=fc_off)
    return slab, meta


# ------------------------------- Pallas kernel --------------------------------
def make_edge_kernel(e_dim, meta):
    """Fused, feature-major kernel over all N*N OD-pair columns:
         disProj MLP -> Predictor fc + SiLU  ->  e_emb   (lane-dense (E-1, N*N))
    """
    dph, n_layers = meta['dph'], meta['n_layers']
    e_out = meta['e_out']
    w_offs, v_off, fc_off = meta['w_offs'], meta['v_off'], meta['fc_off']

    def kernel(dis_ref, od_ref, slab_ref, e_ref):
        f32 = jnp.float32

        def silu(z):
            return z * jax.nn.sigmoid(z)

        dis_row = dis_ref[...]                                     # (1, M)
        dpv = slab_ref[v_off:v_off + dph, 0:2 + n_layers]          # (dph, 2+L)

        # ---- disProj MLP: K=1 first layer is a VPU broadcast-mul, no MXU ----
        h = dpv[:, 0:1] * dis_row + dpv[:, 1:2]                    # (dph, M)
        for l in range(n_layers):
            w_t = slab_ref[w_offs[l]:w_offs[l] + dph, 0:dph]       # (dph, dph)
            h = silu(jnp.dot(w_t, h, preferred_element_type=f32)
                     + dpv[:, 2 + l:3 + l])

        # ---- Predictor: silu(fc([o_rep, d_rep, disProj(dis)]) + b) ----------
        # o/d already expanded to edge columns in the wrapper -> 2 dots total.
        fc = slab_ref[fc_off:fc_off + e_out, 0:2 * e_dim + dph + 1]
        e_pre = (jnp.dot(fc[:, :2 * e_dim], od_ref[...],
                         preferred_element_type=f32)
                 + jnp.dot(fc[:, 2 * e_dim:2 * e_dim + dph], h,
                           preferred_element_type=f32)
                 + fc[:, 2 * e_dim + dph:])
        e_ref[...] = silu(e_pre)                                   # (E-1, M)

    return kernel


def preNN_edge_pallas(dis, o_emb, d_emb, dp_params, fc_params):
    """PreNN's OD-pair ("edge") path — disProj MLP + Predictor — fused into a
    single-step, feature-major Pallas kernel.  Returns e_emb (N, N, E-1)."""
    n = dis.shape[0]
    e_dim = o_emb.shape[1]
    m = n * n

    # Feature-major: features on sublanes, the N*N edge columns on the lane
    # axis (lane-dense (8, 256) output).  Edge column m = i*N + j.
    dis_fm = dis.reshape(1, m)                                     # dis[i, j]
    od_fm = jnp.concatenate(
        [jnp.repeat(o_emb.T, n, axis=1),                           # o[m // N]
         jnp.tile(d_emb.T, (1, n))], axis=0)                       # d[m %  N]

    slab, meta = pack_edge_weights(dp_params, fc_params)
    kernel = make_edge_kernel(e_dim, meta)

    e_fm = pl.pallas_call(
        kernel,
        out_shape=jax.ShapeDtypeStruct((e_dim - 1, m), jnp.float32),
        grid_spec=pltpu.PrefetchScalarGridSpec(
            num_scalar_prefetch=0,
            grid=(1,),                      # whole problem < 0.5 MiB: one step
            in_specs=[
                pl.BlockSpec((1, m), lambda i: (0, 0)),            # dis row
                pl.BlockSpec(od_fm.shape, lambda i: (0, 0)),       # [o_rep; d_rep]
                pl.BlockSpec(slab.shape, lambda i: (0, 0)),        # packed weights
            ],
            out_specs=pl.BlockSpec((e_dim - 1, m), lambda i: (0, 0)),
        ),
        # Single step at N=16 (double-buffer overhead on a 1-step grid is
        # accepted per review).  If N / batch grows: split the lane axis into
        # >=256-lane tiles and mark it "parallel" so v7x's second TensorCore
        # takes half the tiles — safe now that n_emb lives outside the kernel.
        compiler_params=pltpu.CompilerParams(
            dimension_semantics=("arbitrary",)),
    )(dis_fm, od_fm, slab)

    return e_fm.T.reshape(n, n, e_dim - 1)                         # [i, j, :]


# --------------------------- TopoNet_MLP forward ------------------------------
@jax.jit
def toponet_mlp_forward(attr, dis, adj, x_t, t, params):
    """TopoNet_MLP.forward: topo_pre = PreNN(attr, dis, g); return 0."""
    del x_t, t   # accepted for signature fidelity; unused by the reference
    o_emb = gat_forward(attr, adj, params['gat_o'], CONFIG)         # (N, outd)
    d_emb = gat_forward(attr, adj, params['gat_d'], CONFIG)         # (N, outd)

    # n_emb = n_emb_linear(concat(o_emb, d_emb)): a 16x18 @ 18x9 matmul —
    # computed in the jitted wrapper (moved out of the Pallas kernel).
    nl_w, nl_b = params['n_lin']
    n_emb = jnp.concatenate([o_emb, d_emb], axis=-1) @ nl_w + nl_b  # (N, outd)

    e_emb = preNN_edge_pallas(dis, o_emb, d_emb,
                              params['disproj'], params['fc'])      # (N, N, outd-1)

    topo_pre = (n_emb, e_emb)
    # TODO(synk): the reference declares `self.conv_out = nn.Conv2d()` with no
    # arguments and never uses it; its forward returns the literal 0 after
    # computing topo_pre ("to be finished") — reproduced here.
    x_t_minus_1 = 0
    return topo_pre, x_t_minus_1


# ------------------------------------ main ------------------------------------
if __name__ == "__main__":
    cfg = CONFIG
    n = N_NODES
    key = jax.random.PRNGKey(0)
    keys = jax.random.split(key, 12)

    # inputs of TopoNet_MLP.forward(attr, dis, g, x_t, t) ----------------------
    attr = jax.random.normal(keys[0], (n, cfg['GAT_indim']), jnp.float32)
    dis = jax.random.uniform(keys[1], (n, n), jnp.float32) * 10.0
    adj = (jax.random.uniform(keys[2], (n, n)) < 0.3).astype(jnp.float32)
    adj = jnp.maximum(adj, jnp.eye(n, dtype=jnp.float32))           # self loops
    x_t = jax.random.normal(keys[3], (n, n), jnp.float32)           # unused (ref)
    t = jnp.array([37], dtype=jnp.int32)                            # unused (ref)

    # parameters ----------------------------------------------------------------
    heads, hid, outd = cfg['GAT_heads'], cfg['GAT_hiddim'], cfg['GAT_outdim']
    gat_o = [_gat_layer_params(keys[4], cfg['GAT_indim'], hid, heads, False),
             _gat_layer_params(keys[5], hid * heads, outd, heads, True)]
    gat_d = [_gat_layer_params(keys[6], cfg['GAT_indim'], hid, heads, False),
             _gat_layer_params(keys[7], hid * heads, outd, heads, True)]

    dph = cfg['disProj_hiddim']
    dp_win, dp_bin = _linear(keys[8], 1, dph)
    dp_layers = [_linear(k, dph, dph)
                 for k in jax.random.split(keys[9], cfg['disProj_layers'])]
    dp_params = dict(Win=dp_win, bin=dp_bin, layers=dp_layers)

    fc_params = _linear(keys[10], 2 * outd + dph, outd - 1)         # Predictor.fc
    nl_params = _linear(keys[11], 2 * outd, outd)                   # n_emb_linear

    params = dict(gat_o=gat_o, gat_d=gat_d, disproj=dp_params,
                  fc=fc_params, n_lin=nl_params)

    # forward (one jitted dispatch end-to-end) ---------------------------------
    (n_emb, e_emb), x_t_minus_1 = toponet_mlp_forward(attr, dis, adj, x_t, t,
                                                      params)
    jax.block_until_ready(e_emb)
    jax.block_until_ready(n_emb)
    assert n_emb.shape == (n, outd) and e_emb.shape == (n, n, outd - 1)
    assert x_t_minus_1 == 0
    print("KERNEL_OK")
</pallas_src>

<mosaic_0001>
module attributes {stable_mosaic.version = 11 : i64} {
  func.func @kernel(%arg0: i32, %arg1: memref<1x256xf32, #tpu.memory_space<vmem>>, %arg2: memref<18x256xf32, #tpu.memory_space<vmem>>, %arg3: memref<56x35xf32, #tpu.memory_space<vmem>>, %arg4: memref<8x256xf32, #tpu.memory_space<vmem>>) attributes {dimension_semantics = [#tpu.dimension_semantics<arbitrary>], iteration_bounds = array<i64: 1>, scalar_prefetch = 0 : i64, scratch_operands = 0 : i64, tpu.core_type = #tpu.core_type<tc>, window_params = [{pipeline_mode = #tpu.pipeline_mode<synchronous>, transform_indices = @transform_0, window_bounds = array<i64: 1, 256>}, {pipeline_mode = #tpu.pipeline_mode<synchronous>, transform_indices = @transform_1, window_bounds = array<i64: 18, 256>}, {pipeline_mode = #tpu.pipeline_mode<synchronous>, transform_indices = @transform_2, window_bounds = array<i64: 56, 35>}, {pipeline_mode = #tpu.pipeline_mode<synchronous>, transform_indices = @transform_3, window_bounds = array<i64: 8, 256>}]} {
    %c0 = arith.constant 0 : index
    %c0_0 = arith.constant 0 : index
    %0 = vector.load %arg1[%c0, %c0_0] : memref<1x256xf32, #tpu.memory_space<vmem>>, vector<1x256xf32>
    %c32 = arith.constant 32 : index
    %c0_1 = arith.constant 0 : index
    %1 = vector.load %arg3[%c32, %c0_1] : memref<56x35xf32, #tpu.memory_space<vmem>>, vector<16x4xf32>
    %2 = vector.extract_strided_slice %1 {offsets = [0, 0], sizes = [16, 1], strides = [1, 1]} : vector<16x4xf32> to vector<16x1xf32>
    %3 = vector.broadcast %2 : vector<16x1xf32> to vector<16x256xf32>
    %4 = vector.broadcast %0 : vector<1x256xf32> to vector<16x256xf32>
    %5 = arith.mulf %3, %4 : vector<16x256xf32>
    %6 = vector.extract_strided_slice %1 {offsets = [0, 1], sizes = [16, 1], strides = [1, 1]} : vector<16x4xf32> to vector<16x1xf32>
    %7 = vector.broadcast %6 : vector<16x1xf32> to vector<16x256xf32>
    %8 = arith.addf %5, %7 : vector<16x256xf32>
    %c0_2 = arith.constant 0 : index
    %c0_3 = arith.constant 0 : index
    %9 = vector.load %arg3[%c0_2, %c0_3] : memref<56x35xf32, #tpu.memory_space<vmem>>, vector<16x16xf32>
    %cst = arith.constant dense<0.000000e+00> : vector<16x256xf32>
    %10 = tpu.matmul %9, %8, %cst {dimension_numbers = #tpu.dot_dimension_numbers<[1], [0], [0], [1], [0, 0, 1, 1], [], []>} : vector<16x16xf32>, vector<16x256xf32>, vector<16x256xf32> -> vector<16x256xf32>
    %11 = vector.extract_strided_slice %1 {offsets = [0, 2], sizes = [16, 1], strides = [1, 1]} : vector<16x4xf32> to vector<16x1xf32>
    %12 = vector.broadcast %11 : vector<16x1xf32> to vector<16x256xf32>
    %13 = arith.addf %10, %12 : vector<16x256xf32>
    %14 = arith.negf %13 : vector<16x256xf32>
    %15 = math.exp %14 : vector<16x256xf32>
    %cst_4 = arith.constant 1.000000e+00 : f32
    %16 = vector.broadcast %cst_4 : f32 to vector<16x256xf32>
    %17 = arith.addf %16, %15 : vector<16x256xf32>
    %18 = arith.divf %16, %17 : vector<16x256xf32>
    %19 = arith.mulf %13, %18 : vector<16x256xf32>
    %c16 = arith.constant 16 : index
    %c0_5 = arith.constant 0 : index
    %20 = vector.load %arg3[%c16, %c0_5] : memref<56x35xf32, #tpu.memory_space<vmem>>, vector<16x16xf32>
    %cst_6 = arith.constant dense<0.000000e+00> : vector<16x256xf32>
    %21 = tpu.matmul %20, %19, %cst_6 {dimension_numbers = #tpu.dot_dimension_numbers<[1], [0], [0], [1], [0, 0, 1, 1], [], []>} : vector<16x16xf32>, vector<16x256xf32>, vector<16x256xf32> -> vector<16x256xf32>
    %22 = vector.extract_strided_slice %1 {offsets = [0, 3], sizes = [16, 1], strides = [1, 1]} : vector<16x4xf32> to vector<16x1xf32>
    %23 = vector.broadcast %22 : vector<16x1xf32> to vector<16x256xf32>
    %24 = arith.addf %21, %23 : vector<16x256xf32>
    %25 = arith.negf %24 : vector<16x256xf32>
    %26 = math.exp %25 : vector<16x256xf32>
    %cst_7 = arith.constant 1.000000e+00 : f32
    %27 = vector.broadcast %cst_7 : f32 to vector<16x256xf32>
    %28 = arith.addf %27, %26 : vector<16x256xf32>
    %29 = arith.divf %27, %28 : vector<16x256xf32>
    %30 = arith.mulf %24, %29 : vector<16x256xf32>
    %c48 = arith.constant 48 : index
    %c0_8 = arith.constant 0 : index
    %31 = vector.load %arg3[%c48, %c0_8] : memref<56x35xf32, #tpu.memory_space<vmem>>, vector<8x35xf32>
    %32 = vector.extract_strided_slice %31 {offsets = [0, 0], sizes = [8, 18], strides = [1, 1]} : vector<8x35xf32> to vector<8x18xf32>
    %c0_9 = arith.constant 0 : index
    %c0_10 = arith.constant 0 : index
    %33 = vector.load %arg2[%c0_9, %c0_10] : memref<18x256xf32, #tpu.memory_space<vmem>>, vector<18x256xf32>
    %cst_11 = arith.constant dense<0.000000e+00> : vector<8x256xf32>
    %34 = tpu.matmul %32, %33, %cst_11 {dimension_numbers = #tpu.dot_dimension_numbers<[1], [0], [0], [1], [0, 0, 1, 1], [], []>} : vector<8x18xf32>, vector<18x256xf32>, vector<8x256xf32> -> vector<8x256xf32>
    %35 = vector.extract_strided_slice %31 {offsets = [0, 18], sizes = [8, 16], strides = [1, 1]} : vector<8x35xf32> to vector<8x16xf32>
    %cst_12 = arith.constant dense<0.000000e+00> : vector<8x256xf32>
    %36 = tpu.matmul %35, %30, %cst_12 {dimension_numbers = #tpu.dot_dimension_numbers<[1], [0], [0], [1], [0, 0, 1, 1], [], []>} : vector<8x16xf32>, vector<16x256xf32>, vector<8x256xf32> -> vector<8x256xf32>
    %37 = arith.addf %34, %36 : vector<8x256xf32>
    %38 = vector.extract_strided_slice %31 {offsets = [0, 34], sizes = [8, 1], strides = [1, 1]} : vector<8x35xf32> to vector<8x1xf32>
    %39 = vector.broadcast %38 : vector<8x1xf32> to vector<8x256xf32>
    %40 = arith.addf %37, %39 : vector<8x256xf32>
    %41 = arith.negf %40 : vector<8x256xf32>
    %42 = math.exp %41 : vector<8x256xf32>
    %cst_13 = arith.constant 1.000000e+00 : f32
    %43 = vector.broadcast %cst_13 : f32 to vector<8x256xf32>
    %44 = arith.addf %43, %42 : vector<8x256xf32>
    %45 = arith.divf %43, %44 : vector<8x256xf32>
    %46 = arith.mulf %40, %45 : vector<8x256xf32>
    %c0_14 = arith.constant 0 : index
    %c0_15 = arith.constant 0 : index
    %47 = vector.load %arg4[%c0_14, %c0_15] : memref<8x256xf32, #tpu.memory_space<vmem>>, vector<8x256xf32>
    tpu.vector_store %arg4[%c0_14, %c0_15], %46 {strides = array<i32>} : memref<8x256xf32, #tpu.memory_space<vmem>>, vector<8x256xf32>,
    return
  }
  func.func @transform_0(%arg0: i32) -> (i32, i32) {
    %c0_i32 = arith.constant 0 : i32
    %c0_i32_0 = arith.constant 0 : i32
    %c0_i32_1 = arith.constant 0 : i32
    return %c0_i32, %c0_i32_0 : i32, i32
  }
  func.func @transform_1(%arg0: i32) -> (i32, i32) {
    %c0_i32 = arith.constant 0 : i32
    %c0_i32_0 = arith.constant 0 : i32
    %c0_i32_1 = arith.constant 0 : i32
    return %c0_i32, %c0_i32_0 : i32, i32
  }
  func.func @transform_2(%arg0: i32) -> (i32, i32) {
    %c0_i32 = arith.constant 0 : i32
    %c0_i32_0 = arith.constant 0 : i32
    %c0_i32_1 = arith.constant 0 : i32
    return %c0_i32, %c0_i32_0 : i32, i32
  }
  func.func @transform_3(%arg0: i32) -> (i32, i32) {
    %c0_i32 = arith.constant 0 : i32
    %c0_i32_0 = arith.constant 0 : i32
    %c0_i32_1 = arith.constant 0 : i32
    return %c0_i32, %c0_i32_0 : i32, i32
  }
}

</mosaic_0001>

<bundles_post_ra>
// kernel: tile.9
= control target key start
LH: loop header
LB: loop body
LE: loop exit
PB: predicated region body
PF: predicated region fallthrough
CT: control target
= control target key end

     0   :  { %s36_s6 = smov 3  ;;  %s39_s7 = smov 12  ;;  %vm41_vm0 = vcmask 1043458   ;;  %vm46_vm1 = vcmask 1045508   ;;  %vm51_vm2 = vcmask 1047558   ;;  %vm4_vm3 = vcmask 1047556   ;;  %s865_s0 = inlined_call_operand.vmem [shape: f32[9,16,16], index: 0, kind: input, shape index: {}]   ;;  %s866_s1 = inlined_call_operand.vmem [shape: f32[9,256], index: 1, kind: output, shape index: {}]  }
   0x1   :  { %v417_v0 = vld [vmem:[%s865_s0 + $0x7] ss:$16 sm:%s36_s6]   ;;  %s44_s12 = smov 48  ;;  %s49_s13 = smov 192  ;;  %vm6_vm4 = vcmask 130048   ;;  %vm55_vm5 = vcmask 1048448  }
   0x2   :  { %v418_v1 = vld [vmem:[%s865_s0 + $0x7] ss:$16 sm:%s39_s7]   ;;  %s81_s18 = smov 3  ;;  %s58_s21 = smov 3  ;;  %vm108_vm6 = vcmask 917248   ;;  %vm161_vm7 = vcmask 786048  }
   0x3   :  { %v42_v2 = vsel %vm41_vm0, %v418_v1, %v417_v0  ;;  %v419_v3 = vld [vmem:[%s865_s0 + $0x7] ss:$16 sm:%s44_s12]   ;;  %s61_s22 = smov 12  ;;  %s501_s23 = smov 112   ;;  %v421_v8 = vld [vmem:[%s865_s0 + $0xf] ss:$16 sm:%s58_s21]  }
   0x4   :  { %v420_v4 = vld [vmem:[%s865_s0 + $0x7] ss:$16 sm:%s49_s13]   ;;  %v47_v5 = vsel %vm46_vm1, %v419_v3, %v42_v2  ;;  %s66_s26 = smov 48  ;;  %s71_s27 = smov 192  ;;  %v422_v9 = vld [vmem:[%s865_s0 + $0xf] ss:$16 sm:%s61_s22]  }
   0x5   :  { %v426_v6 = vld [vmem:[%s865_s0 + $0x87] ss:$8 sm:%s81_s18]   ;;  %v52_v7 = vsel %vm51_vm2, %v420_v4, %v47_v5  ;;  %s89_s30 = smov 3  ;;  %s92_s2 = smov 12  ;;  %v64_v10 = vsel %vm41_vm0, %v422_v9, %v421_v8  ;;  %vm214_vm8 = vcmask 654848   ;;  %vm267_vm9 = vcmask 523648  }
   0x6   :  { %83 = vrot.lane.b32.xlu1 %v426_v6, %s501_s23  ;;  %53 = vrot.lane.b32.xlu0 %v52_v7, %s501_s23  ;;  %v423_v11 = vld [vmem:[%s865_s0 + $0xf] ss:$16 sm:%s66_s26]   ;;  %s97_s7 = smov 48  ;;  %s102_s8 = smov 192  ;;  %vm320_vm10 = vcmask 392448   ;;  %vm373_vm11 = vcmask 261248  }
   0x7   :  { %v424_v12 = vld [vmem:[%s865_s0 + $0xf] ss:$16 sm:%s71_s27]   ;;  %v69_v13 = vsel %vm46_vm1, %v423_v11, %v64_v10  ;;  %v428_v14 = vld [vmem:[%s865_s0 + $0x6] ss:$16 sm:%s89_s30]   ;;  %s111_s13 = smov 3  ;;  %s114_s18 = smov 12 }
   0x8   :  { %v429_v15 = vld [vmem:[%s865_s0 + $0x6] ss:$16 sm:%s92_s2]   ;;  %v74_v16 = vsel %vm51_vm2, %v424_v12, %v69_v13  ;;  %s119_s19 = smov 48  ;;  %v432_v21 = vld [vmem:[%s865_s0 + $0xe] ss:$16 sm:%s111_s13]   ;;  %s124_s22 = smov 192 }
   0x9   :  { %v95_v17 = vsel %vm41_vm0, %v429_v15, %v428_v14  ;;  %v430_v18 = vld [vmem:[%s865_s0 + $0x6] ss:$16 sm:%s97_s7]   ;;  %v433_v23 = vld [vmem:[%s865_s0 + $0xe] ss:$16 sm:%s114_s18]   ;;  %s142_s28 = smov 3  ;;  %s145_s29 = smov 12 }
   0xa   :  { %v431_v19 = vld [vmem:[%s865_s0 + $0x6] ss:$16 sm:%s102_s8]   ;;  %75 = vrot.lane.b32.xlu0 %v74_v16, %s501_s23  ;;  %v100_v20 = vsel %vm46_vm1, %v430_v18, %v95_v17  ;;  %s134_s23 = smov 3  ;;  %s502_s30 = smov 96   ;;  %v117_v25 = vsel %vm41_vm0, %v433_v23, %v432_v21 }
   0xb   :  { %v105_v22 = vsel %vm51_vm2, %v431_v19, %v100_v20  ;;  %v434_v24 = vld [vmem:[%s865_s0 + $0xe] ss:$16 sm:%s119_s19]   ;;  %s150_s4 = smov 48  ;;  %s155_s5 = smov 192  ;;  %v439_v29 = vld [vmem:[%s865_s0 + $0x5] ss:$16 sm:%s142_s28]  }
   0xc   :  { %106 = vrot.lane.b32.xlu1 %v105_v22, %s502_s30  ;;  %v435_v26 = vld [vmem:[%s865_s0 + $0xe] ss:$16 sm:%s124_s22]   ;;  %v122_v27 = vsel %vm46_vm1, %v434_v24, %v117_v25  ;;  %s164_s10 = smov 3  ;;  %s167_s15 = smov 12 }
   0xd   :  { %v437_v28 = vld [vmem:[%s865_s0 + $0x86] ss:$8 sm:%s134_s23]   ;;  %v127_v30 = vsel %vm51_vm2, %v435_v26, %v122_v27  ;;  %v440_v31 = vld [vmem:[%s865_s0 + $0x5] ss:$16 sm:%s145_s29]   ;;  %s172_s16 = smov 48  ;;  %s177_s19 = smov 192 }
   0xe   :  { %v441_v32 = vld [vmem:[%s865_s0 + $0x5] ss:$16 sm:%s150_s4]   ;;  %128 = vrot.lane.b32.xlu0 %v127_v30, %s502_s30  ;;  %v148_v33 = vsel %vm41_vm0, %v440_v31, %v439_v29  ;;  %s187_s20 = smov 3  ;;  %s195_s23 = smov 3 }
   0xf   :  { %v442_v34 = vld [vmem:[%s865_s0 + $0x5] ss:$16 sm:%s155_s5]   ;;  %v153_v35 = vsel %vm46_vm1, %v441_v32, %v148_v33  ;;  %v443_v36 = vld [vmem:[%s865_s0 + $0xd] ss:$16 sm:%s164_s10]   ;;  %s198_s28 = smov 12  ;;  %s203_s29 = smov 48 }
  0x10   :  { %136 = vrot.lane.b32.xlu1 %v437_v28, %s502_s30  ;;  %v158_v37 = vsel %vm51_vm2, %v442_v34, %v153_v35  ;;  %v444_v38 = vld [vmem:[%s865_s0 + $0xd] ss:$16 sm:%s167_s15]   ;;  %s208_s5 = smov 192  ;;  %s503_s6 = smov 80  }
  0x11   :  { %v445_v39 = vld [vmem:[%s865_s0 + $0xd] ss:$16 sm:%s172_s16]   ;;  %v170_v40 = vsel %vm41_vm0, %v444_v38, %v443_v36  ;;  %v450_v44 = vld [vmem:[%s865_s0 + $0x4] ss:$16 sm:%s195_s23]   ;;  %s217_s9 = smov 3  ;;  %s220_s10 = smov 12 }
  0x12   :  { %v446_v41 = vld [vmem:[%s865_s0 + $0xd] ss:$16 sm:%s177_s19]   ;;  %159 = vrot.lane.b32.xlu0 %v158_v37, %s503_s6  ;;  %v175_v43 = vsel %vm46_vm1, %v445_v39, %v170_v40  ;;  %s225_s15 = smov 48  ;;  %s230_s18 = smov 192 }
  0x13   :  { %v448_v42 = vld [vmem:[%s865_s0 + $0x85] ss:$8 sm:%s187_s20]   ;;  %v180_v45 = vsel %vm51_vm2, %v446_v41, %v175_v43  ;;  %v451_v46 = vld [vmem:[%s865_s0 + $0x4] ss:$16 sm:%s198_s28]   ;;  %s240_s19 = smov 3  ;;  %s248_s24 = smov 3 }
  0x14   :  { %v452_v47 = vld [vmem:[%s865_s0 + $0x4] ss:$16 sm:%s203_s29]   ;;  %181 = vrot.lane.b32.xlu1 %v180_v45, %s503_s6  ;;  %v201_v48 = vsel %vm41_vm0, %v451_v46, %v450_v44  ;;  %s251_s27 = smov 12  ;;  %s256_s28 = smov 48 }
  0x15   :  { %v453_v49 = vld [vmem:[%s865_s0 + $0x4] ss:$16 sm:%s208_s5]   ;;  %v206_v50 = vsel %vm46_vm1, %v452_v47, %v201_v48  ;;  %v454_v51 = vld [vmem:[%s865_s0 + $0xc] ss:$16 sm:%s217_s9]   ;;  %s261_s4 = smov 192  ;;  %s504_s5 = smov 64  }
  0x16   :  { %v455_v52 = vld [vmem:[%s865_s0 + $0xc] ss:$16 sm:%s220_s10]   ;;  %189 = vrot.lane.b32.xlu0 %v448_v42, %s503_s6  ;;  %v211_v53 = vsel %vm51_vm2, %v453_v49, %v206_v50  ;;  %s270_s8 = smov 3  ;;  %s273_s9 = smov 12 }
  0x17   :  { %v223_v54 = vsel %vm41_vm0, %v455_v52, %v454_v51  ;;  %v456_v55 = vld [vmem:[%s865_s0 + $0xc] ss:$16 sm:%s225_s15]   ;;  %v461_v60 = vld [vmem:[%s865_s0 + $0x3] ss:$16 sm:%s248_s24]   ;;  %s278_s14 = smov 48  ;;  %s283_s17 = smov 192 }
  0x18   :  { %v228_v56 = vsel %vm46_vm1, %v456_v55, %v223_v54  ;;  %v457_v57 = vld [vmem:[%s865_s0 + $0xc] ss:$16 sm:%s230_s18]   ;;  %212 = vrot.lane.b32.xlu1 %v211_v53, %s504_s5  ;;  %s293_s18 = smov 3  ;;  %s301_s23 = smov 3 }
  0x19   :  { %v459_v58 = vld [vmem:[%s865_s0 + $0x84] ss:$8 sm:%s240_s19]   ;;  %v233_v59 = vsel %vm51_vm2, %v457_v57, %v228_v56  ;;  %v462_v61 = vld [vmem:[%s865_s0 + $0x3] ss:$16 sm:%s251_s27]   ;;  %s304_s26 = smov 12  ;;  %s309_s27 = smov 48 }
  0x1a   :  { %v463_v62 = vld [vmem:[%s865_s0 + $0x3] ss:$16 sm:%s256_s28]   ;;  %234 = vrot.lane.b32.xlu0 %v233_v59, %s504_s5  ;;  %v254_v63 = vsel %vm41_vm0, %v462_v61, %v461_v60  ;;  %s314_s3 = smov 192  ;;  %s323_s7 = smov 3 }
  0x1b   :  { %v464_v0 = vld [vmem:[%s865_s0 + $0x3] ss:$16 sm:%s261_s4]   ;;  %v259_v1 = vsel %vm46_vm1, %v463_v62, %v254_v63  ;;  %v465_v2 = vld [vmem:[%s865_s0 + $0xb] ss:$16 sm:%s270_s8]   ;;  %s505_s4 = smov 48   ;;  %s326_s8 = smov 12 }
  0x1c   :  { %v466_v3 = vld [vmem:[%s865_s0 + $0xb] ss:$16 sm:%s273_s9]   ;;  %242 = vrot.lane.b32.xlu1 %v459_v58, %s504_s5  ;;  %v264_v4 = vsel %vm51_vm2, %v464_v0, %v259_v1  ;;  %s331_s13 = smov 48  ;;  %s336_s16 = smov 192 }
  0x1d   :  { %v276_v5 = vsel %vm41_vm0, %v466_v3, %v465_v2  ;;  %v467_v6 = vld [vmem:[%s865_s0 + $0xb] ss:$16 sm:%s278_s14]   ;;  %v472_v11 = vld [vmem:[%s865_s0 + $0x2] ss:$16 sm:%s301_s23]   ;;  %s354_s22 = smov 3  ;;  %s357_s25 = smov 12 }
  0x1e   :  { %v281_v7 = vsel %vm46_vm1, %v467_v6, %v276_v5  ;;  %v468_v8 = vld [vmem:[%s865_s0 + $0xb] ss:$16 sm:%s283_s17]   ;;  %265 = vrot.lane.b32.xlu0 %v264_v4, %s505_s4  ;;  %s346_s17 = smov 3  ;;  %s367_s2 = smov 192 }
  0x1f   :  { %v470_v9 = vld [vmem:[%s865_s0 + $0x83] ss:$8 sm:%s293_s18]   ;;  %v286_v10 = vsel %vm51_vm2, %v468_v8, %v281_v7  ;;  %v473_v12 = vld [vmem:[%s865_s0 + $0x2] ss:$16 sm:%s304_s26]   ;;  %s362_s26 = smov 48  ;;  %s384_s14 = smov 48 }
  0x20   :  { %v474_v13 = vld [vmem:[%s865_s0 + $0x2] ss:$16 sm:%s309_s27]   ;;  %287 = vrot.lane.b32.xlu1 %v286_v10, %s505_s4  ;;  %v307_v14 = vsel %vm41_vm0, %v473_v12, %v472_v11  ;;  %v2_v27 = vld [vmem:[%s865_s0] ss:$8 sm:$0xf]   ;;  %s30_s24 = smov 3 }
  0x21   :  { %v475_v15 = vld [vmem:[%s865_s0 + $0x2] ss:$16 sm:%s314_s3]   ;;  %v312_v16 = vsel %vm46_vm1, %v474_v13, %v307_v14  ;;  %v476_v17 = vld [vmem:[%s865_s0 + $0xa] ss:$16 sm:%s323_s7]   ;;  %s376_s3 = smov 3  ;;  %s379_s7 = smov 12 }
  0x22   :  { %v477_v18 = vld [vmem:[%s865_s0 + $0xa] ss:$16 sm:%s326_s8]   ;;  %295 = vrot.lane.b32.xlu0 %v470_v9, %s505_s4  ;;  %v317_v19 = vsel %vm51_vm2, %v475_v15, %v312_v16  ;;  %s506_s4 = smov 32   ;;  %v3_v32 = vld [vmem:[%s865_s0] ss:$8 sm:$0xf0]  }
  0x23   :  { %v329_v20 = vsel %vm41_vm0, %v477_v18, %v476_v17  ;;  %v478_v21 = vld [vmem:[%s865_s0 + $0xa] ss:$16 sm:%s331_s13]   ;;  %v483_v26 = vld [vmem:[%s865_s0 + $0x1] ss:$16 sm:%s354_s22]   ;;  %v5_v36 = vsel %vm4_vm3, %v3_v32, %v2_v27  ;;  %s399_s27 = smov 3  ;;  %s507_s11 = smov 16  }
  0x24   :  { %v334_v22 = vsel %vm46_vm1, %v478_v21, %v329_v20  ;;  %v479_v23 = vld [vmem:[%s865_s0 + $0xa] ss:$16 sm:%s336_s16]   ;;  %318 = vrot.lane.b32.xlu1 %v317_v19, %s506_s4  ;;  %7 = vst.msk [vmem:[%s866_s1] ss:$8 sm:$0x3] %vm6_vm4, %v5_v36  }
  0x25   :  { %v481_v24 = vld [vmem:[%s865_s0 + $0x82] ss:$8 sm:%s346_s17]   ;;  %v339_v25 = vsel %vm51_vm2, %v479_v23, %v334_v22  ;;  %v484_v28 = vld [vmem:[%s865_s0 + $0x1] ss:$16 sm:%s357_s25]   ;;  %s389_s17 = smov 192 }
  0x26   :  { %v485_v29 = vld [vmem:[%s865_s0 + $0x1] ss:$16 sm:%s362_s26]   ;;  %340 = vrot.lane.b32.xlu0 %v339_v25, %s506_s4  ;;  %v360_v30 = vsel %vm41_vm0, %v484_v28, %v483_v26  ;;  %406 = vst.msk [vmem:[%s866_s1 - $0xf] ss:$8 sm:$0xc] %vm6_vm4, %v5_v36  }
  0x27   :  { %v486_v31 = vld [vmem:[%s865_s0 + $0x1] ss:$16 sm:%s367_s2]   ;;  %v365_v33 = vsel %vm46_vm1, %v485_v29, %v360_v30  ;;  %v487_v34 = vld [vmem:[%s865_s0 + $0x9] ss:$16 sm:%s376_s3]  }
  0x28   :  { %v488_v35 = vld [vmem:[%s865_s0 + $0x9] ss:$16 sm:%s379_s7]   ;;  %348 = vrot.lane.b32.xlu1 %v481_v24, %s506_s4  ;;  %v370_v37 = vsel %vm51_vm2, %v486_v31, %v365_v33  ;;  %407 = vst.msk [vmem:[%s866_s1 - $0x1e] ss:$8 sm:$0x30] %vm6_vm4, %v5_v36  }
  0x29   :  { %v382_v38 = vsel %vm41_vm0, %v488_v35, %v487_v34  ;;  %v489_v39 = vld [vmem:[%s865_s0 + $0x9] ss:$16 sm:%s384_s14]   ;;  %408 = vst.msk [vmem:[%s866_s1 - $0x2d] ss:$8 sm:$0xc0] %vm6_vm4, %v5_v36  }
  0x2a   :  { %v409_v40 = vld [vmem:[%s865_s0 + $0x40] ss:$8 sm:$0xf]   ;;  %v387_v41 = vsel %vm46_vm1, %v489_v39, %v382_v38  ;;  %v490_v42 = vld [vmem:[%s865_s0 + $0x9] ss:$16 sm:%s389_s17]   ;;  %371 = vrot.lane.b32.xlu0 %v370_v37, %s507_s11 }
  0x2b   :  { %v392_v43 = vsel %vm51_vm2, %v490_v42, %v387_v41  ;;  %v415_v44 = vld [vmem:[%s865_s0 + $0x80] ss:$8 sm:%s30_s24]   ;;  %v492_v46 = vld [vmem:[%s865_s0 + $0x81] ss:$8 sm:%s399_s27]  }
  0x2c   :  { %v410_v45 = vld [vmem:[%s865_s0 + $0x40] ss:$8 sm:$0xf0]   ;;  %416 = vst.msk [vmem:[%s866_s1 + $0x10] ss:$8 sm:$0x3] %vm6_vm4, %v415_v44   ;;  %393 = vrot.lane.b32.xlu1 %v392_v43, %s507_s11 }
  0x2d   :  { %v19_v47 = vsel %vm4_vm3, %v410_v45, %v409_v40 }
  0x2e   :  { %411 = vst.msk [vmem:[%s866_s1 + $0x4] ss:$8 sm:$0x3] %vm6_vm4, %v19_v47   ;;  %412 = vst.msk [vmem:[%s866_s1 - $0xb] ss:$8 sm:$0xc] %vm6_vm4, %v19_v47   ;;  %401 = vrot.lane.b32.xlu0 %v492_v46, %s507_s11 }
  0x2f   :  { %413 = vst.msk [vmem:[%s866_s1 - $0x1a] ss:$8 sm:$0x30] %vm6_vm4, %v19_v47   ;;  %414 = vst.msk [vmem:[%s866_s1 - $0x29] ss:$8 sm:$0xc0] %vm6_vm4, %v19_v47  }
  0x78   :  { %v84_v48 = vpop.permute.xlu1 %83   ;;  %v54_v49 = vpop.permute.xlu0 %53  }
  0x79   :  { %427 = vst.msk [vmem:[%s866_s1 + $0x10] ss:$8 sm:$0x3] %vm55_vm5, %v84_v48   ;;  %56 = vst.msk [vmem:[%s866_s1] sm:$0xff] %vm55_vm5, %v54_v49  }
  0x7c   :  { %v76_v50 = vpop.permute.xlu0 %75  }
  0x7d   :  { %425 = vst.msk [vmem:[%s866_s1 + $0x8] sm:$0xff] %vm55_vm5, %v76_v50  }
  0x7e   :  { %v107_v51 = vpop.permute.xlu1 %106  }
  0x7f   :  { %109 = vst.msk [vmem:[%s866_s1] sm:$0xff] %vm108_vm6, %v107_v51  }
  0x80   :  { %v129_v52 = vpop.permute.xlu0 %128  }
  0x81   :  { %436 = vst.msk [vmem:[%s866_s1 + $0x8] sm:$0xff] %vm108_vm6, %v129_v52  }
  0x82   :  { %v137_v53 = vpop.permute.xlu1 %136  }
  0x83   :  { %438 = vst.msk [vmem:[%s866_s1 + $0x10] ss:$8 sm:$0x3] %vm108_vm6, %v137_v53  }
  0x84   :  { %v160_v54 = vpop.permute.xlu0 %159  }
  0x85   :  { %162 = vst.msk [vmem:[%s866_s1] sm:$0xff] %vm161_vm7, %v160_v54  }
  0x86   :  { %v182_v55 = vpop.permute.xlu1 %181  }
  0x87   :  { %447 = vst.msk [vmem:[%s866_s1 + $0x8] sm:$0xff] %vm161_vm7, %v182_v55  }
  0x88   :  { %v190_v56 = vpop.permute.xlu0 %189  }
  0x89   :  { %449 = vst.msk [vmem:[%s866_s1 + $0x10] ss:$8 sm:$0x3] %vm161_vm7, %v190_v56  }
  0x8a   :  { %v213_v57 = vpop.permute.xlu1 %212  }
  0x8b   :  { %215 = vst.msk [vmem:[%s866_s1] sm:$0xff] %vm214_vm8, %v213_v57  }
  0x8c   :  { %v235_v58 = vpop.permute.xlu0 %234  }
  0x8d   :  { %458 = vst.msk [vmem:[%s866_s1 + $0x8] sm:$0xff] %vm214_vm8, %v235_v58  }
  0x8e   :  { %v243_v59 = vpop.permute.xlu1 %242  }
  0x8f   :  { %460 = vst.msk [vmem:[%s866_s1 + $0x10] ss:$8 sm:$0x3] %vm214_vm8, %v243_v59  }
  0x90   :  { %v266_v60 = vpop.permute.xlu0 %265  }
  0x91   :  { %268 = vst.msk [vmem:[%s866_s1] sm:$0xff] %vm267_vm9, %v266_v60  }
  0x92   :  { %v288_v61 = vpop.permute.xlu1 %287  }
  0x93   :  { %469 = vst.msk [vmem:[%s866_s1 + $0x8] sm:$0xff] %vm267_vm9, %v288_v61  }
  0x94   :  { %v296_v62 = vpop.permute.xlu0 %295  }
  0x95   :  { %471 = vst.msk [vmem:[%s866_s1 + $0x10] ss:$8 sm:$0x3] %vm267_vm9, %v296_v62  }
  0x96   :  { %v319_v63 = vpop.permute.xlu1 %318  }
  0x97   :  { %321 = vst.msk [vmem:[%s866_s1] sm:$0xff] %vm320_vm10, %v319_v63  }
  0x98   :  { %v341_v0 = vpop.permute.xlu0 %340  }
  0x99   :  { %480 = vst.msk [vmem:[%s866_s1 + $0x8] sm:$0xff] %vm320_vm10, %v341_v0  }
  0x9a   :  { %v349_v1 = vpop.permute.xlu1 %348  }
  0x9b   :  { %482 = vst.msk [vmem:[%s866_s1 + $0x10] ss:$8 sm:$0x3] %vm320_vm10, %v349_v1  }
  0x9c   :  { %v372_v2 = vpop.permute.xlu0 %371  }
  0x9d   :  { %374 = vst.msk [vmem:[%s866_s1] sm:$0xff] %vm373_vm11, %v372_v2  }
  0x9e   :  { %v394_v3 = vpop.permute.xlu1 %393  }
  0x9f   :  { %491 = vst.msk [vmem:[%s866_s1 + $0x8] sm:$0xff] %vm373_vm11, %v394_v3  }
  0xa0   :  { %v402_v4 = vpop.permute.xlu0 %401  }
  0xa1   :  { %493 = vst.msk [vmem:[%s866_s1 + $0x10] ss:$8 sm:$0x3] %vm373_vm11, %v402_v4  }

// kernel: toponet_mlp_forward.1
= control target key start
LH: loop header
LB: loop body
LE: loop exit
PB: predicated region body
PF: predicated region fallthrough
CT: control target
= control target key end

     0   :  { %v578_v0 = vmov 1   ;;  %v579_v1 = vmov 0   ;;  %v580_v4 = vmov 0.0   ;;  %v581_v5 = vmov 2   ;;  %s583_s23 = smov 110   ;;  %s669_s2 = inlined_call_operand.vmem [shape: f32[56,35], index: 2, kind: input, shape index: {}]   ;;  %s670_s0 = inlined_call_operand.vmem [shape: f32[1,256], index: 0, kind: input, shape index: {}]   ;;  %s671_s1 = inlined_call_operand.vmem [shape: f32[18,256], index: 1, kind: input, shape index: {}]   ;;  %s672_s3 = inlined_call_operand.vmem [shape: f32[8,256], index: 3, kind: output, shape index: {}]  }
   0x1   :  { %531 = vset.pattern.permute.xlu1 %v578_v0  ;;  %530 = vset.pattern.permute.xlu0 %v579_v1  ;;  %v15_v2 = vld [vmem:[%s669_s2 + $0x20] sm:$0xff]  ;;  %v16_v3 = vld [vmem:[%s669_s2 + $0x28] sm:$0xff]  ;;  %v28_v6 = vlaneseq  ;;  %vm64_vm0 = vcmask 130048   ;;  %v582_v29 = vmov 3   ;;  %v629_v30 = vld [vmem:[%s669_s2 + $0x30] sm:$0xff]  ;;  %vm383_vm1 = vcmask 1041408  }
   0x2   :  { %43 = vperm.xlu1 %531, %v15_v2   ;;  %19 = vperm.xlu0 %530, %v15_v2   ;;  %v14_v10 = vld [vmem:[%s670_s0] sm:$0x3]  ;;  %v55_v28 = vld [vmem:[%s669_s2 + $0x8] sm:$0xff]  ;;  %v176_v63 = vld [vmem:[%s669_s2 + $0x10] sm:$0xff]  ;;  %vm380_vm2 = vcmask 146432  }
   0x3   :  { %135 = vmatprep.mubr.f32.mxu0 %v580_v4  ;;  %256 = vmatprep.mubr.f32.mxu1 %v580_v4  ;;  %v29_v7 = vshrl.u32 %v28_v6, 7  ;;  %v54_v27 = vld [vmem:[%s669_s2] sm:$0xff]  ;;  %v177_v0 = vld [vmem:[%s669_s2 + $0x18] sm:$0xff]  ;;  %v299_v1 = vld [vmem:[%s671_s1 + $0x8] sm:$0xff] }
   0x4   :  { %v300_v6 = vld [vmem:[%s671_s1 + $0x10] sm:$0xff] }
   0x5   :  { %v30_v8 = vsub.s32 0, %v29_v7  ;;  %v34_v9 = vsub.s32 1, %v29_v7 }
   0x6   :  { %47 = vperm.xlu1 %531, %v16_v3   ;;  %24 = vperm.xlu0 %530, %v16_v3  }
   0x7   :  { %v31_v11 = vrot.slane %v14_v10, %v30_v8  ;;  %v35_v12 = vrot.slane %v14_v10, %v34_v9  ;;  %v302_v8 = vld [vmem:[%s671_s1 + $0x20] sm:$0x3]  ;;  %v584_v9 = vmov 34  }
   0xa   :  { %532 = vset.pattern.permute.xlu0 %v581_v5  ;;  %533 = vset.pattern.permute.xlu1 %v581_v5  ;;  %v298_v5 = vld [vmem:[%s671_s1] sm:$0xff] }
   0xb   :  { %57 = vperm.xlu0 %532, %v15_v2   ;;  %61 = vperm.xlu1 %533, %v16_v3   ;;  %v519_v7 = vpack.c.bf16 %v300_v6, %v298_v5 }
   0xf   :  { %534 = vset.pattern.permute.xlu1 %v582_v29  ;;  %535 = vset.pattern.permute.xlu0 %v582_v29 }
  0x10   :  { %179 = vperm.xlu1 %534, %v15_v2   ;;  %183 = vperm.xlu0 %535, %v16_v3   ;;  %v301_v2 = vld [vmem:[%s671_s1 + $0x18] sm:$0xff] }
  0x11   :  { %v517_v3 = vpack.c.bf16 %v301_v2, %v299_v1 }
  0x14   :  { %305 = vrot.lane.b32.xlu1 %v629_v30, %s583_s23  ;;  %537 = vset.pattern.permute.xlu0 %v584_v9 }
  0x15   :  { %536 = vset.pattern.permute.xlu1 %v584_v9 }
  0x18   :  { %462 = vperm.xlu1 %536, %v629_v30  }
  0x81   :  { %v44_v13 = vpop.permute.xlu1 %43  ;;  %v20_v14 = vpop.permute.xlu0 %19 }
  0x82   :  { %v38_v15 = vmul.f32 %v31_v11, %v20_v14  ;;  %v39_v16 = vmul.f32 %v35_v12, %v20_v14 }
  0x84   :  { %v51_v21 = vadd.f32 %v44_v13, %v39_v16  ;;  %v50_v23 = vadd.f32 %v44_v13, %v38_v15 }
  0x85   :  { %v25_v17 = vpop.permute.xlu0 %24  ;;  %v48_v20 = vpop.permute.xlu1 %47 }
  0x86   :  { %v40_v18 = vmul.f32 %v31_v11, %v25_v17  ;;  %v41_v19 = vmul.f32 %v35_v12, %v25_v17 }
  0x88   :  { %v53_v22 = vadd.f32 %v48_v20, %v41_v19  ;;  %v52_v24 = vadd.f32 %v48_v20, %v40_v18 }
  0x8a   :  { %v505_v25 = vpack.c.bf16 %v53_v22, %v51_v21  ;;  %v507_v26 = vpack.c.bf16 %v52_v24, %v50_v23  ;;  %v58_v31 = vpop.permute.xlu0 %57  ;;  %v62_v36 = vpop.permute.xlu1 %61 }
  0x8c   :  { %506 = vmatprep.subr.bf16.mxu0 %v505_v25 }
  0x8d   :  { %508 = vmatpush1.bf16.msra.mxu0 %v507_v26 }
  0x8e   :  { %518 = vmatprep.subr.bf16.mxu0 %v517_v3 }
  0x8f   :  { %v180_v10 = vpop.permute.xlu1 %179  ;;  %v184_v15 = vpop.permute.xlu0 %183 }
  0x90   :  { %487 = vmatmul.mubr.msk.f32.vlgmr.msra.gmra.mrb[0].mxu0 %vm64_vm0, %v54_v27 }
  0x91   :  { %141 = vmatprep.mubr.f32.mxu0 %v580_v4  ;;  %520 = vmatpush1.bf16.msra.mxu0 %v519_v7 }
  0x94   :  { %488 = vmatmul.mubr.msk.f32.gmra.mrb[2].mxu0 %vm64_vm0, %v55_v28 }
  0x95   :  { %454 = vmatprep.mubr.f32.mxu0 %v580_v4 }
 0x163   :  { %v137_v32 = vpop.f32.mrb[0].mxu0 }
 0x164   :  { %v138_v33 = vadd.f32 %v137_v32, %v58_v31  ;;  %v139_v34 = vpop.f32.mrb[1].mxu0 }
 0x165   :  { %v140_v35 = vadd.f32 %v139_v34, %v58_v31 }
 0x166   :  { %v489_v37 = vmul.f32 -1.442695, %v138_v33 }
 0x167   :  { %v490_v38 = vmul.f32 -1.442695, %v140_v35  ;;  %v143_v39 = vpop.f32.mrb[2].mxu0 }
 0x168   :  { %538 = vpow2.f32 %v489_v37  ;;  %v144_v40 = vadd.f32 %v143_v39, %v62_v36  ;;  %v145_v41 = vpop.f32.mrb[3].mxu0 }
 0x169   :  { %540 = vpow2.f32 %v490_v38  ;;  %v146_v42 = vadd.f32 %v145_v41, %v62_v36 }
 0x16a   :  { %v491_v43 = vmul.f32 -1.442695, %v144_v40 }
 0x16b   :  { %v492_v44 = vmul.f32 -1.442695, %v146_v42 }
 0x16c   :  { %542 = vpow2.f32 %v491_v43 }
 0x16d   :  { %544 = vpow2.f32 %v492_v44 }
 0x172   :  { %v539_v45 = vpop.eup %538 }
 0x173   :  { %v541_v46 = vpop.eup %540  ;;  %v160_v47 = vadd.f32 1.0, %v539_v45 }
 0x174   :  { %v161_v48 = vadd.f32 1.0, %v541_v46 }
 0x175   :  { %546 = vrcp.f32 %v160_v47 }
 0x176   :  { %v543_v49 = vpop.eup %542  ;;  %548 = vrcp.f32 %v161_v48 }
 0x177   :  { %v545_v50 = vpop.eup %544  ;;  %v162_v51 = vadd.f32 1.0, %v543_v49 }
 0x178   :  { %v163_v52 = vadd.f32 1.0, %v545_v50 }
 0x179   :  { %550 = vrcp.f32 %v162_v51 }
 0x17a   :  { %552 = vrcp.f32 %v163_v52 }
 0x17f   :  { %v547_v53 = vpop.eup %546 }
 0x180   :  { %v549_v54 = vpop.eup %548  ;;  %v172_v57 = vmul.f32 %v547_v53, %v138_v33 }
 0x181   :  { %v173_v59 = vmul.f32 %v549_v54, %v140_v35 }
 0x183   :  { %v551_v55 = vpop.eup %550 }
 0x184   :  { %v553_v56 = vpop.eup %552  ;;  %v174_v58 = vmul.f32 %v551_v55, %v144_v40 }
 0x185   :  { %v175_v60 = vmul.f32 %v553_v56, %v146_v42  ;;  %v306_v42 = vpop.permute.xlu1 %305 }
 0x186   :  { %v511_v61 = vpack.c.bf16 %v174_v58, %v172_v57 }
 0x187   :  { %v509_v62 = vpack.c.bf16 %v175_v60, %v173_v59 }
 0x189   :  { %510 = vmatprep.subr.bf16.mxu1 %v509_v62  ;;  %v463_v46 = vpop.permute.xlu1 %462 }
 0x18a   :  { %512 = vmatpush1.bf16.msra.mxu1 %v511_v61 }
 0x18d   :  { %493 = vmatmul.mubr.msk.f32.vlgmr.msra.gmra.mrb[0].mxu1 %vm64_vm0, %v176_v63 }
 0x18e   :  { %262 = vmatprep.mubr.f32.mxu1 %v580_v4 }
 0x191   :  { %494 = vmatmul.mubr.msk.f32.gmra.mrb[2].mxu1 %vm64_vm0, %v177_v0 }
 0x192   :  { %373 = vmatprep.mubr.f32.mxu1 %v580_v4  ;;  %v303_v4 = vld [vmem:[%s671_s1 + $0x28] sm:$0x3] }
 0x193   :  { %500 = vmatprep.subr.msk.mxu0 %vm383_vm1, %v303_v4 }
 0x194   :  { %501 = vmatpush1.msk.msra.mxu0 %vm383_vm1, %v302_v8 }
 0x195   :  { %502 = vmatmul.mubr.msk.f32.vlgmr.msra.gmra.mrb[4].mxu0 %vm380_vm2, %v629_v30 }
 0x260   :  { %v258_v11 = vpop.f32.mrb[0].mxu1 }
 0x261   :  { %v259_v12 = vadd.f32 %v258_v11, %v180_v10  ;;  %v260_v13 = vpop.f32.mrb[1].mxu1 }
 0x262   :  { %v261_v14 = vadd.f32 %v260_v13, %v180_v10 }
 0x263   :  { %v495_v16 = vmul.f32 -1.442695, %v259_v12 }
 0x264   :  { %v496_v17 = vmul.f32 -1.442695, %v261_v14  ;;  %v264_v18 = vpop.f32.mrb[2].mxu1 }
 0x265   :  { %554 = vpow2.f32 %v495_v16  ;;  %v265_v19 = vadd.f32 %v264_v18, %v184_v15  ;;  %v266_v20 = vpop.f32.mrb[3].mxu1 }
 0x266   :  { %556 = vpow2.f32 %v496_v17  ;;  %v267_v21 = vadd.f32 %v266_v20, %v184_v15 }
 0x267   :  { %v497_v22 = vmul.f32 -1.442695, %v265_v19 }
 0x268   :  { %v498_v23 = vmul.f32 -1.442695, %v267_v21  ;;  %v456_v43 = vpop.f32.mrb[4].mxu0 }
 0x269   :  { %558 = vpow2.f32 %v497_v22  ;;  %v458_v44 = vpop.f32.mrb[5].mxu0 }
 0x26a   :  { %560 = vpow2.f32 %v498_v23 }
 0x26f   :  { %v555_v24 = vpop.eup %554 }
 0x270   :  { %v557_v25 = vpop.eup %556  ;;  %v281_v26 = vadd.f32 1.0, %v555_v24 }
 0x271   :  { %v282_v27 = vadd.f32 1.0, %v557_v25 }
 0x272   :  { %562 = vrcp.f32 %v281_v26 }
 0x273   :  { %v559_v28 = vpop.eup %558  ;;  %564 = vrcp.f32 %v282_v27 }
 0x274   :  { %v561_v29 = vpop.eup %560  ;;  %v283_v30 = vadd.f32 1.0, %v559_v28 }
 0x275   :  { %v284_v31 = vadd.f32 1.0, %v561_v29 }
 0x276   :  { %566 = vrcp.f32 %v283_v30 }
 0x277   :  { %568 = vrcp.f32 %v284_v31 }
 0x27c   :  { %v563_v32 = vpop.eup %562 }
 0x27d   :  { %v565_v33 = vpop.eup %564  ;;  %v293_v36 = vmul.f32 %v563_v32, %v259_v12 }
 0x27e   :  { %v294_v38 = vmul.f32 %v565_v33, %v261_v14 }
 0x280   :  { %v567_v34 = vpop.eup %566 }
 0x281   :  { %v569_v35 = vpop.eup %568  ;;  %v295_v37 = vmul.f32 %v567_v34, %v265_v19 }
 0x282   :  { %v296_v39 = vmul.f32 %v569_v35, %v267_v21 }
 0x283   :  { %v515_v40 = vpack.c.bf16 %v295_v37, %v293_v36 }
 0x284   :  { %v513_v41 = vpack.c.bf16 %v296_v39, %v294_v38 }
 0x286   :  { %514 = vmatprep.subr.bf16.mxu1 %v513_v41 }
 0x287   :  { %516 = vmatpush1.bf16.msra.mxu1 %v515_v40 }
 0x28a   :  { %499 = vmatmul.mubr.msk.f32.vlgmr.msra.gmra.mrb[4].mxu1 %vm64_vm0, %v306_v42 }
 0x35d   :  { %v375_v45 = vpop.f32.mrb[4].mxu1 }
 0x35e   :  { %v457_v47 = vadd.f32 %v456_v43, %v375_v45  ;;  %v377_v48 = vpop.f32.mrb[5].mxu1 }
 0x35f   :  { %v459_v49 = vadd.f32 %v458_v44, %v377_v48 }
 0x360   :  { %v465_v50 = vadd.f32 %v463_v46, %v457_v47 }
 0x361   :  { %v466_v51 = vadd.f32 %v463_v46, %v459_v49 }
 0x362   :  { %v503_v52 = vmul.f32 -1.442695, %v465_v50 }
 0x363   :  { %v504_v53 = vmul.f32 -1.442695, %v466_v51 }
 0x364   :  { %570 = vpow2.f32 %v503_v52 }
 0x365   :  { %572 = vpow2.f32 %v504_v53 }
 0x36e   :  { %v571_v54 = vpop.eup %570 }
 0x36f   :  { %v573_v55 = vpop.eup %572  ;;  %v473_v56 = vadd.f32 1.0, %v571_v54 }
 0x370   :  { %v474_v57 = vadd.f32 1.0, %v573_v55 }
 0x371   :  { %574 = vrcp.f32 %v473_v56 }
 0x372   :  { %576 = vrcp.f32 %v474_v57 }
 0x37b   :  { %v575_v58 = vpop.eup %574 }
 0x37c   :  { %v577_v59 = vpop.eup %576  ;;  %v479_v60 = vmul.f32 %v575_v58, %v465_v50 }
 0x37d   :  { %v480_v61 = vmul.f32 %v577_v59, %v466_v51 }
 0x37e   :  { %481 = vst [vmem:[%s672_s3] sm:$0xff] %v479_v60 }
 0x37f   :  { %482 = vst [vmem:[%s672_s3 + $0x8] sm:$0xff] %v480_v61 }

</bundles_post_ra>
